<compile_context>
chip_gen: v7x
topology: tpu7x:2x2x1
jax: 0.10.0
libtpu: 0.0.40
codegen_flags: <defaults>
</compile_context>

<pallas_src>
import functools
import math

import jax
import jax.numpy as jnp
from jax import lax
from jax.experimental import pallas as pl
from jax.experimental.pallas import tpu as pltpu

_BN_EPS = 1e-5


def _fold_bn(gamma, beta, mean, var, eps=_BN_EPS):
    scale = gamma / jnp.sqrt(var + eps)
    bias = beta - mean * scale
    return scale, bias


# ------------------------------ Pallas kernels ------------------------------


def _conv1x1_bn_lrelu_kernel(x_ref, w_ref, s_ref, b_ref, o_ref, *, slope):
    # x_ref: (1, HW, Cin)   w_ref: (Cin, Cout)   s_ref/b_ref: (1, Cout)
    x = x_ref[0]
    y = jnp.dot(x, w_ref[...],
                precision=lax.Precision.HIGHEST,
                preferred_element_type=jnp.float32)
    y = y * s_ref[...] + b_ref[...]
    y = jnp.where(y > 0, y, slope * y)
    o_ref[0] = y.astype(o_ref.dtype)


def conv1x1_bn_lrelu(x, w, scale, bias, slope):
    """x: (B, HW, Cin), w: (Cin, Cout), scale/bias: (1, Cout) -> (B, HW, Cout)."""
    B, HW, Cin = x.shape
    Cout = w.shape[1]
    return pl.pallas_call(
        functools.partial(_conv1x1_bn_lrelu_kernel, slope=slope),
        out_shape=jax.ShapeDtypeStruct((B, HW, Cout), x.dtype),
        grid_spec=pltpu.PrefetchScalarGridSpec(
            num_scalar_prefetch=0,
            grid=(B,),
            in_specs=[
                pl.BlockSpec((1, HW, Cin), lambda b: (b, 0, 0)),
                pl.BlockSpec((Cin, Cout), lambda b: (0, 0)),
                pl.BlockSpec((1, Cout), lambda b: (0, 0)),
                pl.BlockSpec((1, Cout), lambda b: (0, 0)),
            ],
            out_specs=pl.BlockSpec((1, HW, Cout), lambda b: (b, 0, 0)),
        ),
        compiler_params=pltpu.CompilerParams(
            dimension_semantics=("parallel",)),
    )(x, w, scale, bias)


def _add_conv3x3_bn_lrelu_kernel(x_ref, u_ref, w_ref, s_ref, b_ref, o_ref, *,
                                 H, W, slope):
    # x_ref/u_ref: (1, H+2, W+2, Cin) zero-padded; w_ref: (9, Cin, Cout)
    src = x_ref[0] + u_ref[0]                      # fused skip-add in VMEM
    cout = o_ref.shape[-1]
    acc = jnp.zeros((H * W, cout), jnp.float32)
    for dy in range(3):
        for dx in range(3):
            patch = src[dy:dy + H, dx:dx + W, :]           # (H, W, Cin)
            patch = patch.reshape(H * W, patch.shape[-1])  # collapse leading dims
            acc = acc + jnp.dot(patch, w_ref[3 * dy + dx],
                                precision=lax.Precision.HIGHEST,
                                preferred_element_type=jnp.float32)
    y = acc * s_ref[...] + b_ref[...]
    y = jnp.where(y > 0, y, slope * y)
    o_ref[0] = y.astype(o_ref.dtype)


def add_conv3x3_bn_lrelu(x_pad, u_pad, w9, scale, bias, H, W, slope):
    """(x + u) -> 3x3 conv (stride 1, padding already applied) -> BN -> LeakyReLU.

    x_pad, u_pad: (B, H+2, W+2, Cin);  w9: (9, Cin, Cout);  returns (B, H*W, Cout).
    """
    B, Hp, Wp, Cin = x_pad.shape
    Cout = w9.shape[2]
    return pl.pallas_call(
        functools.partial(_add_conv3x3_bn_lrelu_kernel, H=H, W=W, slope=slope),
        out_shape=jax.ShapeDtypeStruct((B, H * W, Cout), x_pad.dtype),
        grid_spec=pltpu.PrefetchScalarGridSpec(
            num_scalar_prefetch=0,
            grid=(B,),
            in_specs=[
                pl.BlockSpec((1, Hp, Wp, Cin), lambda b: (b, 0, 0, 0)),
                pl.BlockSpec((1, Hp, Wp, Cin), lambda b: (b, 0, 0, 0)),
                pl.BlockSpec((9, Cin, Cout), lambda b: (0, 0, 0)),
                pl.BlockSpec((1, Cout), lambda b: (0, 0)),
                pl.BlockSpec((1, Cout), lambda b: (0, 0)),
            ],
            out_specs=pl.BlockSpec((1, H * W, Cout), lambda b: (b, 0, 0)),
        ),
        compiler_params=pltpu.CompilerParams(
            dimension_semantics=("parallel",)),
    )(x_pad, u_pad, w9, scale, bias)


# --------------------------- FPN forward (Pallas) ----------------------------


def _nearest_idx(out_size, in_size):
    # Matches F.interpolate(mode='nearest'): src = floor(dst * in / out).
    return (jnp.arange(out_size) * in_size) // out_size


def fpn_forward_pallas(inputs, params, slope):
    """inputs: list of 3 NCHW arrays; returns [output1, output2, output3] (NCHW)."""

    def lateral(x_nchw, p):
        B, Cin, H, W = x_nchw.shape
        x = jnp.transpose(x_nchw, (0, 2, 3, 1)).reshape(B, H * W, Cin)
        w = jnp.transpose(p["w"][:, :, 0, 0])              # (Cin, Cout)
        s, b = _fold_bn(p["gamma"], p["beta"], p["mean"], p["var"])
        y = conv1x1_bn_lrelu(x, w, s[None, :], b[None, :], slope)
        return y.reshape(B, H, W, -1)                      # channels-last

    def upsample_nearest(x_cl, Ho, Wo):
        # TODO(synk): nearest-neighbour gather left to XLA (pure index gather).
        ih = _nearest_idx(Ho, x_cl.shape[1])
        iw = _nearest_idx(Wo, x_cl.shape[2])
        return x_cl[:, ih][:, :, iw]

    def merge(x_cl, u_cl, p):
        B, H, W, C = x_cl.shape
        xp = jnp.pad(x_cl, ((0, 0), (1, 1), (1, 1), (0, 0)))
        up = jnp.pad(u_cl, ((0, 0), (1, 1), (1, 1), (0, 0)))
        w9 = jnp.transpose(p["w"], (2, 3, 1, 0)).reshape(9, C, -1)
        s, b = _fold_bn(p["gamma"], p["beta"], p["mean"], p["var"])
        y = add_conv3x3_bn_lrelu(xp, up, w9, s[None, :], b[None, :], H, W, slope)
        return y.reshape(B, H, W, -1)

    o1 = lateral(inputs[0], params["output1"])
    o2 = lateral(inputs[1], params["output2"])
    o3 = lateral(inputs[2], params["output3"])

    up3 = upsample_nearest(o3, o2.shape[1], o2.shape[2])
    o2m = merge(o2, up3, params["merge2"])

    up2 = upsample_nearest(o2m, o1.shape[1], o1.shape[2])
    o1m = merge(o1, up2, params["merge1"])

    to_nchw = lambda t: jnp.transpose(t, (0, 3, 1, 2))
    return [to_nchw(o1m), to_nchw(o2m), to_nchw(o3)]


# ------------------------------ Pure-JAX reference ---------------------------


def fpn_forward_ref(inputs, params, slope):
    def leaky(x):
        return jnp.where(x > 0, x, slope * x)

    def conv_bn_act(x, p, pad):
        y = lax.conv_general_dilated(
            x, p["w"], (1, 1), pad,
            dimension_numbers=("NCHW", "OIHW", "NCHW"),
            precision=lax.Precision.HIGHEST)
        s, b = _fold_bn(p["gamma"], p["beta"], p["mean"], p["var"])
        return leaky(y * s[None, :, None, None] + b[None, :, None, None])

    def up_nearest(x, Ho, Wo):
        ih = _nearest_idx(Ho, x.shape[2])
        iw = _nearest_idx(Wo, x.shape[3])
        return x[:, :, ih][:, :, :, iw]

    o1 = conv_bn_act(inputs[0], params["output1"], ((0, 0), (0, 0)))
    o2 = conv_bn_act(inputs[1], params["output2"], ((0, 0), (0, 0)))
    o3 = conv_bn_act(inputs[2], params["output3"], ((0, 0), (0, 0)))
    up3 = up_nearest(o3, o2.shape[2], o2.shape[3])
    o2m = conv_bn_act(o2 + up3, params["merge2"], ((1, 1), (1, 1)))
    up2 = up_nearest(o2m, o1.shape[2], o1.shape[3])
    o1m = conv_bn_act(o1 + up2, params["merge1"], ((1, 1), (1, 1)))
    return [o1m, o2m, o3]


# ------------------------------------ main ------------------------------------


def make_conv_bn_params(key, cin, cout, k):
    kw, kg, kb, km, kv = jax.random.split(key, 5)
    w = jax.random.normal(kw, (cout, cin, k, k), jnp.float32) / math.sqrt(cin * k * k)
    return dict(
        w=w,
        gamma=jax.random.uniform(kg, (cout,), jnp.float32, 0.5, 1.5),
        beta=0.1 * jax.random.normal(kb, (cout,), jnp.float32),
        mean=0.1 * jax.random.normal(km, (cout,), jnp.float32),
        var=jax.random.uniform(kv, (cout,), jnp.float32, 0.5, 1.5),
    )


if __name__ == "__main__":
    in_channels_list = [16, 32, 64]
    out_channels = 64
    leaky = 0.1 if out_channels <= 64 else 0.0
    B = 2
    sizes = [(16, 16), (8, 8), (4, 4)]       # FPN pyramid: each level half the previous

    key = jax.random.PRNGKey(0)
    keys = jax.random.split(key, 8)

    inputs = [
        jax.random.normal(keys[i], (B, in_channels_list[i], sizes[i][0], sizes[i][1]),
                          jnp.float32)
        for i in range(3)
    ]
    params = {
        "output1": make_conv_bn_params(keys[3], in_channels_list[0], out_channels, 1),
        "output2": make_conv_bn_params(keys[4], in_channels_list[1], out_channels, 1),
        "output3": make_conv_bn_params(keys[5], in_channels_list[2], out_channels, 1),
        "merge1": make_conv_bn_params(keys[6], out_channels, out_channels, 3),
        "merge2": make_conv_bn_params(keys[7], out_channels, out_channels, 3),
    }

    outs = fpn_forward_pallas(inputs, params, leaky)
    outs = jax.block_until_ready(outs)

    refs = fpn_forward_ref(inputs, params, leaky)

    for o, r in zip(outs, refs):
        assert o.shape == r.shape, (o.shape, r.shape)
        assert o.dtype == r.dtype, (o.dtype, r.dtype)
        err = float(jnp.max(jnp.abs(o - r)))
        assert jnp.allclose(o, r, atol=1e-3, rtol=1e-3), f"max abs err = {err}"

    print("KERNEL_OK")
</pallas_src>

<mosaic_0001>
module attributes {stable_mosaic.version = 11 : i64} {
  func.func @_conv1x1_bn_lrelu_kernel(%arg0: i32, %arg1: memref<1x256x16xf32, #tpu.memory_space<vmem>>, %arg2: memref<16x64xf32, #tpu.memory_space<vmem>>, %arg3: memref<1x64xf32, #tpu.memory_space<vmem>>, %arg4: memref<1x64xf32, #tpu.memory_space<vmem>>, %arg5: memref<1x256x64xf32, #tpu.memory_space<vmem>>) attributes {dimension_semantics = [#tpu.dimension_semantics<parallel>], iteration_bounds = array<i64: 2>, scalar_prefetch = 0 : i64, scratch_operands = 0 : i64, tpu.core_type = #tpu.core_type<tc>, window_params = [{transform_indices = @transform_0, window_bounds = array<i64: 1, 256, 16>}, {pipeline_mode = #tpu.pipeline_mode<synchronous>, transform_indices = @transform_1, window_bounds = array<i64: 16, 64>}, {pipeline_mode = #tpu.pipeline_mode<synchronous>, transform_indices = @transform_2, window_bounds = array<i64: 1, 64>}, {pipeline_mode = #tpu.pipeline_mode<synchronous>, transform_indices = @transform_3, window_bounds = array<i64: 1, 64>}, {transform_indices = @transform_4, window_bounds = array<i64: 1, 256, 64>}]} {
    %c0 = arith.constant 0 : index
    %c0_0 = arith.constant 0 : index
    %c0_1 = arith.constant 0 : index
    %0 = vector.load %arg1[%c0, %c0_0, %c0_1] : memref<1x256x16xf32, #tpu.memory_space<vmem>>, vector<1x256x16xf32>
    %1 = vector.shape_cast %0 : vector<1x256x16xf32> to vector<256x16xf32>
    %c0_2 = arith.constant 0 : index
    %c0_3 = arith.constant 0 : index
    %2 = vector.load %arg2[%c0_2, %c0_3] : memref<16x64xf32, #tpu.memory_space<vmem>>, vector<16x64xf32>
    %cst = arith.constant dense<0.000000e+00> : vector<256x64xf32>
    %3 = tpu.matmul %1, %2, %cst {dimension_numbers = #tpu.dot_dimension_numbers<[1], [0], [0], [1], [0, 0, 1, 1], [], []>, precision = #tpu.contract_precision<fp32>} : vector<256x16xf32>, vector<16x64xf32>, vector<256x64xf32> -> vector<256x64xf32>
    %c0_4 = arith.constant 0 : index
    %c0_5 = arith.constant 0 : index
    %4 = vector.load %arg3[%c0_4, %c0_5] : memref<1x64xf32, #tpu.memory_space<vmem>>, vector<1x64xf32>
    %5 = vector.broadcast %4 : vector<1x64xf32> to vector<256x64xf32>
    %6 = arith.mulf %3, %5 : vector<256x64xf32>
    %c0_6 = arith.constant 0 : index
    %c0_7 = arith.constant 0 : index
    %7 = vector.load %arg4[%c0_6, %c0_7] : memref<1x64xf32, #tpu.memory_space<vmem>>, vector<1x64xf32>
    %8 = vector.broadcast %7 : vector<1x64xf32> to vector<256x64xf32>
    %9 = arith.addf %6, %8 : vector<256x64xf32>
    %cst_8 = arith.constant 0.000000e+00 : f32
    %10 = vector.broadcast %cst_8 : f32 to vector<256x64xf32>
    %11 = arith.cmpf ogt, %9, %10 : vector<256x64xf32>
    %cst_9 = arith.constant 1.000000e-01 : f32
    %12 = vector.broadcast %cst_9 : f32 to vector<256x64xf32>
    %13 = arith.mulf %12, %9 : vector<256x64xf32>
    %14 = arith.select %11, %9, %13 : vector<256x64xi1>, vector<256x64xf32>
    %c0_10 = arith.constant 0 : index
    %c0_11 = arith.constant 0 : index
    %c0_12 = arith.constant 0 : index
    %15 = vector.load %arg5[%c0_10, %c0_11, %c0_12] : memref<1x256x64xf32, #tpu.memory_space<vmem>>, vector<1x256x64xf32>
    %16 = vector.shape_cast %15 : vector<1x256x64xf32> to vector<256x64xf32>
    %17 = vector.shape_cast %14 : vector<256x64xf32> to vector<1x256x64xf32>
    tpu.vector_store %arg5[%c0_10, %c0_11, %c0_12], %17 {strides = array<i32>} : memref<1x256x64xf32, #tpu.memory_space<vmem>>, vector<1x256x64xf32>,
    return
  }
  func.func @transform_0(%arg0: i32) -> (i32, i32, i32) {
    %c0_i32 = arith.constant 0 : i32
    %c0_i32_0 = arith.constant 0 : i32
    %c0_i32_1 = arith.constant 0 : i32
    return %arg0, %c0_i32, %c0_i32_0 : i32, i32, i32
  }
  func.func @transform_1(%arg0: i32) -> (i32, i32) {
    %c0_i32 = arith.constant 0 : i32
    %c0_i32_0 = arith.constant 0 : i32
    %c0_i32_1 = arith.constant 0 : i32
    return %c0_i32, %c0_i32_0 : i32, i32
  }
  func.func @transform_2(%arg0: i32) -> (i32, i32) {
    %c0_i32 = arith.constant 0 : i32
    %c0_i32_0 = arith.constant 0 : i32
    %c0_i32_1 = arith.constant 0 : i32
    return %c0_i32, %c0_i32_0 : i32, i32
  }
  func.func @transform_3(%arg0: i32) -> (i32, i32) {
    %c0_i32 = arith.constant 0 : i32
    %c0_i32_0 = arith.constant 0 : i32
    %c0_i32_1 = arith.constant 0 : i32
    return %c0_i32, %c0_i32_0 : i32, i32
  }
  func.func @transform_4(%arg0: i32) -> (i32, i32, i32) {
    %c0_i32 = arith.constant 0 : i32
    %c0_i32_0 = arith.constant 0 : i32
    %c0_i32_1 = arith.constant 0 : i32
    return %arg0, %c0_i32, %c0_i32_0 : i32, i32, i32
  }
}

</mosaic_0001>

<bundles_post_ra>
// kernel: tpu_custom_call.1
= control target key start
LH: loop header
LB: loop body
LE: loop exit
PB: predicated region body
PF: predicated region fallthrough
CT: control target
= control target key end

     0   :  { %s3139_s15 = smov 0   ;;  %s3739_s0 = inlined_call_operand.vmem [shape: f32[2,256,16], index: 0, kind: input, shape index: {}]   ;;  %s3740_s1 = inlined_call_operand.vmem [shape: f32[16,64], index: 1, kind: input, shape index: {}]   ;;  %s3741_s2 = inlined_call_operand.vmem [shape: f32[1,64], index: 2, kind: input, shape index: {}]   ;;  %s3742_s3 = inlined_call_operand.vmem [shape: f32[1,64], index: 3, kind: input, shape index: {}]   ;;  %s3743_s4 = inlined_call_operand.vmem [shape: f32[2,256,64], index: 4, kind: output, shape index: {}]  }
   0x1 LB: > { %s2383_s16 = sadd.s32 4294967295, %s3112_s15   ;;  %p2387_p0 = scmp.ge.s32.totalorder %s3112_s15, 1  ;;  %s3112_s15 = sphi %s3139_s15, %s14_s15  }
   0x2   : > { %p162_p1 = scmp.lt.s32.totalorder %s3112_s15, 3 }
   0x4   : > { %p163_p2 = pnand %p2387_p0, %p162_p1 }
   0x6   : > { %166 = sbr.rel (%p163_p2) target bundleno = 442 (0x1ba), region = 36 }
   0xd   : > { %v230_v0 = vld [vmem:[%s3740_s1] sm:$0xff]  ;;  %v231_v1 = vld [vmem:[%s3740_s1 + $0x8] sm:$0xff]  ;;  %p188_p3 = scmp.lt.s32.totalorder %s2383_s16, 1  ;;  %vm232_vm0 = vcmask 130048   ;;  %vm2295_vm2 = vcmask 523264  }
   0xe   : > { %v330_v2 = vand.u32 4294901760, %v230_v0  ;;  %v333_v3 = vand.u32 4294901760, %v231_v1 }
   0xf   : > { %s3799_s16 = smov (!%p188_p3, %s2383_s16), 1 }
  0x10   : > { %v3155_v4 = vpack.c.bf16 %v333_v3, %v330_v2  ;;  %v718_v5 = vsub.f32 %v230_v0, %v330_v2  ;;  %v725_v6 = vsub.f32 %v231_v1, %v333_v3  ;;  %s2396_s21 = sshll.u32 %s3799_s16, 8 }
  0x11   : > { %s3165_s24 = scalar_lea.vmem %s3739_s0, %s2396_s21  ;;  %s3610_s5 = scalar_lea.vmem %s3743_s4, %s2396_s21 }
  0x12   : > { %2927 = vmatprep.subr.bf16.mxu0 %v3155_v4  ;;  %2915 = vmatprep.subr.bf16.mxu1 %v3155_v4  ;;  %v719_v7 = vand.u32 4294901760, %v718_v5  ;;  %v726_v8 = vand.u32 4294901760, %v725_v6  ;;  %v198_v9 = vld [vmem:[%s3165_s24] sm:$0xff]  ;;  %v199_v10 = vld [vmem:[%s3165_s24 + $0x8] sm:$0xff]  ;;  %v200_v11 = vld [vmem:[%s3165_s24 + $0x10] sm:$0xff]  ;;  %v3172_v12 = vpack.c.bf16 %v725_v6, %v718_v5 }
  0x13   : > { %2929 = vmatpush3.bf16.msra.mxu0 %v3155_v4  ;;  %2917 = vmatpush3.bf16.msra.mxu1 %v3155_v4  ;;  %v234_v13 = vsel %vm232_vm0, %v198_v9, 0  ;;  %v237_v14 = vsel %vm232_vm0, %v199_v10, 0  ;;  %v201_v17 = vld [vmem:[%s3165_s24 + $0x18] sm:$0xff]  ;;  %v202_v18 = vld [vmem:[%s3165_s24 + $0x20] sm:$0xff]  ;;  %v240_v21 = vsel %vm232_vm0, %v200_v11, 0  ;;  %v203_v23 = vld [vmem:[%s3165_s24 + $0x28] sm:$0xff] }
  0x14   : > { %v720_v15 = vsub.f32 %v718_v5, %v719_v7  ;;  %v727_v16 = vsub.f32 %v725_v6, %v726_v8  ;;  %v3178_v19 = vand.u32 4294901760, %v234_v13  ;;  %v3180_v20 = vand.u32 4294901760, %v237_v14  ;;  %v204_v32 = vld [vmem:[%s3165_s24 + $0x30] sm:$0xff]  ;;  %v205_v33 = vld [vmem:[%s3165_s24 + $0x38] sm:$0xff]  ;;  %v206_v54 = vld [vmem:[%s3165_s24 + $0x40] sm:$0xff] }
  0x15   : > { %v2930_v22 = vpack.c.bf16 %v726_v8, %v719_v7  ;;  %v3184_v26 = vand.u32 4294901760, %v240_v21  ;;  %v243_v27 = vsel %vm232_vm0, %v201_v17, 0  ;;  %v246_v31 = vsel %vm232_vm0, %v202_v18, 0  ;;  %v207_v55 = vld [vmem:[%s3165_s24 + $0x48] sm:$0xff]  ;;  %v208_v0 = vld [vmem:[%s3165_s24 + $0x50] sm:$0xff]  ;;  %v209_v1 = vld [vmem:[%s3165_s24 + $0x58] sm:$0xff] }
  0x16   : > { %v721_v24 = vand.u32 4294901760, %v720_v15  ;;  %v728_v25 = vand.u32 4294901760, %v727_v16  ;;  %v3188_v28 = vsub.f32 %v234_v13, %v3178_v19  ;;  %v3191_v29 = vsub.f32 %v237_v14, %v3180_v20  ;;  %v210_v10 = vld [vmem:[%s3165_s24 + $0x60] sm:$0xff]  ;;  %v211_v11 = vld [vmem:[%s3165_s24 + $0x68] sm:$0xff] }
  0x17   : > { %2931 = vmatprep.subr.bf16.mxu0 %v2930_v22  ;;  %v3193_v30 = vand.u32 4294901760, %v243_v27  ;;  %v3199_v35 = vsub.f32 %v240_v21, %v3184_v26  ;;  %v3201_v36 = vand.u32 4294901760, %v246_v31  ;;  %v249_v37 = vsel %vm232_vm0, %v203_v23, 0 }
  0x18   : > { %v2918_v34 = vpack.c.bf16 %v728_v25, %v721_v24  ;;  %v398_v38 = vand.u32 4294901760, %v3188_v28  ;;  %v408_v39 = vand.u32 4294901760, %v3191_v29  ;;  %v3209_v41 = vand.u32 4294901760, %v249_v37 }
  0x19   : > { %v3207_v40 = vsub.f32 %v243_v27, %v3193_v30  ;;  %v418_v42 = vand.u32 4294901760, %v3199_v35  ;;  %v3213_v43 = vsub.f32 %v246_v31, %v3201_v36  ;;  %v252_v44 = vsel %vm232_vm0, %v204_v32, 0  ;;  %v212_v31 = vld [vmem:[%s3165_s24 + $0x70] sm:$0xff]  ;;  %v213_v32 = vld [vmem:[%s3165_s24 + $0x78] sm:$0xff] }
  0x1a   : > { %2919 = vmatprep.subr.bf16.mxu1 %v2918_v34  ;;  %v255_v45 = vsel %vm232_vm0, %v205_v33, 0  ;;  %2762 = vmatprep.mubr.f32.mxu0 %v398_v38  ;;  %v399_v46 = vsub.f32 %v3188_v28, %v398_v38  ;;  %v409_v47 = vsub.f32 %v3191_v29, %v408_v39  ;;  %v3221_v49 = vsub.f32 %v249_v37, %v3209_v41 }
  0x1b   : > { %v428_v48 = vand.u32 4294901760, %v3207_v40  ;;  %2763 = vmatmul.mubr.f32.vlgmr.msra.gmra.mrb[0].mxu0 %v408_v39  ;;  %v419_v50 = vsub.f32 %v3199_v35, %v418_v42  ;;  %v438_v51 = vand.u32 4294901760, %v3213_v43  ;;  %v3225_v52 = vand.u32 4294901760, %v252_v44 }
  0x1c   : > { %v3227_v53 = vand.u32 4294901760, %v255_v45  ;;  %v400_v56 = vand.u32 4294901760, %v399_v46  ;;  %2765 = vmatprep.mubr.f32.mxu0 %v418_v42  ;;  %v410_v57 = vand.u32 4294901760, %v409_v47  ;;  %2933 = vmatpush3.bf16.msra.mxu0 %v2930_v22  ;;  %v448_v59 = vand.u32 4294901760, %v3221_v49 }
  0x1d   : > { %v429_v58 = vsub.f32 %v3207_v40, %v428_v48  ;;  %v420_v60 = vand.u32 4294901760, %v419_v50  ;;  %v439_v61 = vsub.f32 %v3213_v43, %v438_v51  ;;  %v3235_v62 = vsub.f32 %v252_v44, %v3225_v52  ;;  %2935 = vmatprep.subr.bf16.mxu0 %v3155_v4 }
  0x1e   : > { %v3238_v63 = vsub.f32 %v255_v45, %v3227_v53  ;;  %2606 = vmatprep.mubr.f32.mxu1 %v400_v56  ;;  %v449_v2 = vsub.f32 %v3221_v49, %v448_v59  ;;  %v258_v3 = vsel %vm232_vm0, %v206_v54, 0  ;;  %v261_v5 = vsel %vm232_vm0, %v207_v55, 0 }
  0x1f   : > { %2607 = vmatmul.mubr.f32.vlgmr.msra.gmra.mrb[0].mxu1 %v410_v57  ;;  %2766 = vmatmul.mubr.f32.gmra.mrb[2].mxu0 %v428_v48  ;;  %v430_v6 = vand.u32 4294901760, %v429_v58  ;;  %v458_v7 = vand.u32 4294901760, %v3235_v62  ;;  %v3248_v9 = vand.u32 4294901760, %v258_v3  ;;  %v440_v13 = vand.u32 4294901760, %v439_v61  ;;  %v214_v57 = vld [vmem:[%s3165_s24 + $0x80] sm:$0xff] }
  0x20   : > { %3762 = vst [vmem:[#allocation2_spill] sm:$0xff] %v3238_v63  ;;  %v468_v8 = vand.u32 4294901760, %v3238_v63  ;;  %2921 = vmatpush3.bf16.msra.mxu1 %v2918_v34  ;;  %2609 = vmatprep.mubr.f32.mxu1 %v420_v60  ;;  %v3252_v14 = vand.u32 4294901760, %v261_v5  ;;  %v264_v15 = vsel %vm232_vm0, %v208_v0, 0  ;;  %v267_v16 = vsel %vm232_vm0, %v209_v1, 0 }
  0x21   : > { %2768 = vmatprep.mubr.f32.mxu0 %v438_v51  ;;  %v450_v17 = vand.u32 4294901760, %v449_v2  ;;  %v459_v18 = vsub.f32 %v3235_v62, %v458_v7  ;;  %v3258_v21 = vsub.f32 %v258_v3, %v3248_v9  ;;  %v3260_v22 = vand.u32 4294901760, %v264_v15  ;;  %2923 = vmatprep.subr.bf16.mxu1 %v3172_v12  ;;  %v215_v2 = vld [vmem:[%s3165_s24 + $0x88] sm:$0xff]  ;;  %v216_v3 = vld [vmem:[%s3165_s24 + $0x90] sm:$0xff] }
  0x22   : > { %v3264_v23 = vsub.f32 %v261_v5, %v3252_v14  ;;  %v3266_v24 = vand.u32 4294901760, %v267_v16  ;;  %v270_v25 = vsel %vm232_vm0, %v210_v10, 0  ;;  %v273_v27 = vsel %vm232_vm0, %v211_v11, 0 }
  0x23   : > { %3763 = vst [vmem:[#allocation3_spill] sm:$0xff] %v3258_v21  ;;  %2610 = vmatmul.mubr.f32.gmra.mrb[2].mxu1 %v430_v6  ;;  %2769 = vmatmul.mubr.f32.gmra.mrb[4].mxu0 %v448_v59  ;;  %v460_v33 = vand.u32 4294901760, %v459_v18  ;;  %v478_v34 = vand.u32 4294901760, %v3258_v21  ;;  %v469_v37 = vsub.f32 %v3238_v63, %v468_v8  ;;  %v3275_v38 = vsub.f32 %v264_v15, %v3260_v22  ;;  %v217_v15 = vld [vmem:[%s3165_s24 + $0x98] sm:$0xff] }
  0x24   : > { %3764 = vst [vmem:[#allocation4_spill] sm:$0xff] %v3264_v23  ;;  %2612 = vmatprep.mubr.f32.mxu1 %v440_v13  ;;  %2771 = vmatprep.mubr.f32.mxu0 %v458_v7  ;;  %v488_v39 = vand.u32 4294901760, %v3264_v23  ;;  %v3279_v42 = vsub.f32 %v267_v16, %v3266_v24  ;;  %v3281_v44 = vand.u32 4294901760, %v270_v25  ;;  %v3283_v45 = vand.u32 4294901760, %v273_v27 }
  0x25   : > { %3765 = vst [vmem:[#allocation5_spill] sm:$0xff] %v3275_v38  ;;  %v479_v46 = vsub.f32 %v3258_v21, %v478_v34  ;;  %v498_v47 = vand.u32 4294901760, %v3275_v38  ;;  %v276_v48 = vsel %vm232_vm0, %v212_v31, 0  ;;  %v279_v50 = vsel %vm232_vm0, %v213_v32, 0  ;;  %v228_v21 = vld [vmem:[%s3165_s24 + $0xf0] sm:$0xff] }
  0x26   : > { %3766 = vst [vmem:[#allocation6_spill] sm:$0xff] %v3279_v42  ;;  %v489_v51 = vsub.f32 %v3264_v23, %v488_v39  ;;  %v508_v54 = vand.u32 4294901760, %v3279_v42  ;;  %v3292_v55 = vsub.f32 %v270_v25, %v3281_v44  ;;  %v3295_v56 = vsub.f32 %v273_v27, %v3283_v45  ;;  %v218_v27 = vld [vmem:[%s3165_s24 + $0xa0] sm:$0xff] }
  0x27   : > { %2613 = vmatmul.mubr.f32.gmra.mrb[4].mxu1 %v450_v17  ;;  %2772 = vmatmul.mubr.f32.gmra.mrb[6].mxu0 %v468_v8  ;;  %v470_v58 = vand.u32 4294901760, %v469_v37  ;;  %v3298_v59 = vand.u32 4294901760, %v276_v48  ;;  %v3300_v60 = vand.u32 4294901760, %v279_v50  ;;  %v480_v61 = vand.u32 4294901760, %v479_v46 }
  0x28   : > { %3767 = vst [vmem:[#allocation7_spill] sm:$0xff] %v3292_v55  ;;  %3768 = vst [vmem:[#allocation8_spill] sm:$0xff] %v3295_v56  ;;  %2615 = vmatprep.mubr.f32.mxu1 %v460_v33  ;;  %2774 = vmatprep.mubr.f32.mxu0 %v478_v34  ;;  %v499_v0 = vsub.f32 %v3275_v38, %v498_v47  ;;  %v518_v1 = vand.u32 4294901760, %v3292_v55  ;;  %v490_v5 = vand.u32 4294901760, %v489_v51  ;;  %v282_v7 = vsel %vm232_vm0, %v214_v57, 0 }
  0x29   : > { %v3307_v6 = vsub.f32 %v276_v48, %v3298_v59  ;;  %v509_v8 = vsub.f32 %v3279_v42, %v508_v54  ;;  %v528_v10 = vand.u32 4294901760, %v3295_v56  ;;  %v3313_v11 = vsub.f32 %v279_v50, %v3300_v60 }
  0x2a   : > { %v3315_v13 = vand.u32 4294901760, %v282_v7  ;;  %v519_v16 = vsub.f32 %v3292_v55, %v518_v1  ;;  %v285_v18 = vsel %vm232_vm0, %v215_v2, 0  ;;  %v288_v25 = vsel %vm232_vm0, %v216_v3, 0 }
  0x2b   : > { %3769 = vst [vmem:[#allocation9_spill] sm:$0xff] %v3307_v6  ;;  %3770 = vst [vmem:[#allocation10_spill] sm:$0xff] %v3313_v11  ;;  %2616 = vmatmul.mubr.f32.gmra.mrb[6].mxu1 %v470_v58  ;;  %2775 = vmatmul.mubr.f32.gmra.mrb[8].mxu0 %v488_v39  ;;  %v538_v17 = vand.u32 4294901760, %v3307_v6  ;;  %v500_v31 = vand.u32 4294901760, %v499_v0  ;;  %v3326_v33 = vand.u32 4294901760, %v285_v18  ;;  %v3328_v34 = vand.u32 4294901760, %v288_v25 }
  0x2c   : > { %2618 = vmatprep.mubr.f32.mxu1 %v480_v61  ;;  %2777 = vmatprep.mubr.f32.mxu0 %v498_v47  ;;  %v3324_v32 = vsub.f32 %v282_v7, %v3315_v13  ;;  %v291_v37 = vsel %vm232_vm0, %v217_v15, 0  ;;  %v219_v39 = vld [vmem:[%s3165_s24 + $0xa8] sm:$0xff]  ;;  %v510_v46 = vand.u32 4294901760, %v509_v8  ;;  %v529_v48 = vsub.f32 %v3295_v56, %v528_v10  ;;  %v220_v47 = vld [vmem:[%s3165_s24 + $0xb0] sm:$0xff] }
  0x2d   : > { %v548_v50 = vand.u32 4294901760, %v3313_v11  ;;  %v294_v51 = vsel %vm232_vm0, %v218_v27, 0  ;;  %v520_v57 = vand.u32 4294901760, %v519_v16  ;;  %v539_v58 = vsub.f32 %v3307_v6, %v538_v17  ;;  %v222_v27 = vld [vmem:[%s3165_s24 + $0xc0] sm:$0xff] }
  0x2e   : > { %3771 = vst [vmem:[#allocation11_spill] sm:$0xff] %v3324_v32  ;;  %v3338_v61 = vsub.f32 %v285_v18, %v3326_v33  ;;  %v3340_v0 = vand.u32 4294901760, %v291_v37  ;;  %v558_v2 = vand.u32 4294901760, %v3324_v32  ;;  %v3344_v3 = vsub.f32 %v288_v25, %v3328_v34 }
  0x2f   : > { %2619 = vmatmul.mubr.f32.gmra.mrb[8].mxu1 %v490_v5  ;;  %2778 = vmatmul.mubr.f32.gmra.mrb[10].mxu0 %v508_v54  ;;  %v3346_v7 = vand.u32 4294901760, %v294_v51  ;;  %v297_v54 = vsel %vm232_vm0, %v219_v39, 0  ;;  %v221_v5 = vld [vmem:[%s3165_s24 + $0xb8] sm:$0xff]  ;;  %v300_v8 = vsel %vm232_vm0, %v220_v47, 0  ;;  %v530_v15 = vand.u32 4294901760, %v529_v48 }
  0x30   : > { %3772 = vst [vmem:[#allocation12_spill] sm:$0xff] %v3338_v61  ;;  %2621 = vmatprep.mubr.f32.mxu1 %v500_v31  ;;  %2780 = vmatprep.mubr.f32.mxu0 %v518_v1  ;;  %3773 = vst [vmem:[#allocation13_spill] sm:$0xff] %v3344_v3  ;;  %v3351_v16 = vand.u32 4294901760, %v297_v54  ;;  %v3353_v18 = vand.u32 4294901760, %v300_v8  ;;  %v549_v1 = vsub.f32 %v3313_v11, %v548_v50  ;;  %v568_v25 = vand.u32 4294901760, %v3338_v61  ;;  %v223_v11 = vld [vmem:[%s3165_s24 + $0xc8] sm:$0xff] }
  0x31   : > { %v3359_v31 = vsub.f32 %v291_v37, %v3340_v0  ;;  %v303_v39 = vsel %vm232_vm0, %v221_v5, 0  ;;  %v540_v48 = vand.u32 4294901760, %v539_v58  ;;  %v559_v47 = vsub.f32 %v3324_v32, %v558_v2 }
  0x32   : > { %v578_v6 = vand.u32 4294901760, %v3344_v3  ;;  %v3370_v56 = vsub.f32 %v297_v54, %v3351_v16  ;;  %v3373_v37 = vsub.f32 %v300_v8, %v3353_v18  ;;  %v550_v58 = vand.u32 4294901760, %v549_v1 }
  0x33   : > { %2622 = vmatmul.mubr.f32.gmra.mrb[10].mxu1 %v510_v46  ;;  %2781 = vmatmul.mubr.f32.gmra.mrb[12].mxu0 %v528_v10  ;;  %3774 = vst [vmem:[#allocation14_spill] sm:$0xff] %v3359_v31  ;;  %v3365_v46 = vsub.f32 %v294_v51, %v3346_v7  ;;  %v306_v10 = vsel %vm232_vm0, %v222_v27, 0  ;;  %v569_v51 = vsub.f32 %v3338_v61, %v568_v25  ;;  %v588_v5 = vand.u32 4294901760, %v3359_v31 }
  0x34   : > { %2624 = vmatprep.mubr.f32.mxu1 %v520_v57  ;;  %2783 = vmatprep.mubr.f32.mxu0 %v538_v17  ;;  %3776 = vst [vmem:[#allocation16_spill] sm:$0xff] %v3370_v56  ;;  %3777 = vst [vmem:[#allocation17_spill] sm:$0xff] %v3373_v37  ;;  %v3375_v57 = vand.u32 4294901760, %v303_v39  ;;  %v224_v17 = vld [vmem:[%s3165_s24 + $0xd0] sm:$0xff]  ;;  %v3380_v27 = vand.u32 4294901760, %v306_v10  ;;  %v560_v54 = vand.u32 4294901760, %v559_v47  ;;  %v579_v8 = vsub.f32 %v3344_v3, %v578_v6 }
  0x35   : > { %3775 = vst [vmem:[#allocation15_spill] sm:$0xff] %v3365_v46  ;;  %v598_v32 = vand.u32 4294901760, %v3365_v46  ;;  %v309_v55 = vsel %vm232_vm0, %v223_v11, 0  ;;  %v608_v1 = vand.u32 4294901760, %v3370_v56  ;;  %v618_v61 = vand.u32 4294901760, %v3373_v37 }
  0x36   : > { %v3390_v42 = vsub.f32 %v303_v39, %v3375_v57  ;;  %v589_v47 = vsub.f32 %v3359_v31, %v588_v5  ;;  %v3395_v11 = vsub.f32 %v306_v10, %v3380_v27  ;;  %v580_v3 = vand.u32 4294901760, %v579_v8 }
  0x37   : > { %2625 = vmatmul.mubr.f32.gmra.mrb[12].mxu1 %v530_v15  ;;  %2784 = vmatmul.mubr.f32.gmra.mrb[14].mxu0 %v548_v50  ;;  %v312_v15 = vsel %vm232_vm0, %v224_v17, 0  ;;  %v225_v50 = vld [vmem:[%s3165_s24 + $0xd8] sm:$0xff]  ;;  %v3397_v17 = vand.u32 4294901760, %v309_v55  ;;  %v599_v38 = vsub.f32 %v3365_v46, %v598_v32  ;;  %v619_v10 = vsub.f32 %v3373_v37, %v618_v61 }
  0x38   : > { %2627 = vmatprep.mubr.f32.mxu1 %v540_v48  ;;  %2786 = vmatprep.mubr.f32.mxu0 %v558_v2  ;;  %3778 = vst [vmem:[#allocation18_spill] sm:$0xff] %v3390_v42  ;;  %v226_v48 = vld [vmem:[%s3165_s24 + $0xe0] sm:$0xff]  ;;  %v570_v2 = vand.u32 4294901760, %v569_v51  ;;  %3779 = vst [vmem:[#allocation19_spill] sm:$0xff] %v3395_v11  ;;  %v3400_v23 = vand.u32 4294901760, %v312_v15  ;;  %v315_v39 = vsel %vm232_vm0, %v225_v50, 0  ;;  %v609_v51 = vsub.f32 %v3370_v56, %v608_v1 }
  0x39   : > { %v628_v31 = vand.u32 4294901760, %v3390_v42  ;;  %v3411_v8 = vsub.f32 %v309_v55, %v3397_v17  ;;  %v3413_v50 = vand.u32 4294901760, %v315_v39  ;;  %v620_v63 = vand.u32 4294901760, %v619_v10 }
  0x3a   : > { %v3416_v56 = vsub.f32 %v312_v15, %v3400_v23 }
  0x3b   : > { %2628 = vmatmul.mubr.f32.gmra.mrb[14].mxu1 %v550_v58  ;;  %2787 = vmatmul.mubr.f32.gmra.mrb[16].mxu0 %v568_v25  ;;  %v318_v25 = vsel %vm232_vm0, %v226_v48, 0  ;;  %v227_v58 = vld [vmem:[%s3165_s24 + $0xe8] sm:$0xff]  ;;  %v600_v48 = vand.u32 4294901760, %v599_v38  ;;  %v629_v55 = vsub.f32 %v3390_v42, %v628_v31 }
  0x3c   : > { %2630 = vmatprep.mubr.f32.mxu1 %v560_v54  ;;  %2789 = vmatprep.mubr.f32.mxu0 %v578_v6  ;;  %v590_v6 = vand.u32 4294901760, %v589_v47  ;;  %v638_v54 = vand.u32 4294901760, %v3395_v11  ;;  %v3418_v46 = vand.u32 4294901760, %v318_v25  ;;  %v321_v37 = vsel %vm232_vm0, %v227_v58, 0 }
  0x3d   : > { %v610_v47 = vand.u32 4294901760, %v609_v51  ;;  %v3429_v15 = vand.u32 4294901760, %v321_v37  ;;  %v630_v10 = vand.u32 4294901760, %v629_v55 }
  0x3e   : > { %v639_v38 = vsub.f32 %v3395_v11, %v638_v54  ;;  %v3433_v58 = vsub.f32 %v318_v25, %v3418_v46 }
  0x3f   : > { %2631 = vmatmul.mubr.f32.gmra.mrb[16].mxu1 %v570_v2  ;;  %2790 = vmatmul.mubr.f32.gmra.mrb[18].mxu0 %v588_v5  ;;  %v324_v5 = vsel %vm232_vm0, %v228_v21, 0  ;;  %v229_v2 = vld [vmem:[%s3165_s24 + $0xf8] sm:$0xff]  ;;  %v658_v21 = vand.u32 4294901760, %v3416_v56  ;;  %v3441_v11 = vsub.f32 %v321_v37, %v3429_v15 }
  0x40   : > { %2633 = vmatprep.mubr.f32.mxu1 %v580_v3  ;;  %2792 = vmatprep.mubr.f32.mxu0 %v598_v32  ;;  %v648_v3 = vand.u32 4294901760, %v3411_v8  ;;  %v3427_v32 = vsub.f32 %v315_v39, %v3413_v50  ;;  %v3435_v51 = vand.u32 4294901760, %v324_v5  ;;  %v640_v25 = vand.u32 4294901760, %v639_v38 }
  0x41   : > { %v678_v42 = vand.u32 4294901760, %v3433_v58  ;;  %v688_v37 = vand.u32 4294901760, %v3441_v11 }
  0x42   : > { %v668_v39 = vand.u32 4294901760, %v3427_v32 }
  0x43   : > { %2634 = vmatmul.mubr.f32.gmra.mrb[18].mxu1 %v590_v6  ;;  %2793 = vmatmul.mubr.f32.gmra.mrb[20].mxu0 %v608_v1  ;;  %v327_v1 = vsel %vm232_vm0, %v229_v2, 0  ;;  %v649_v6 = vsub.f32 %v3411_v8, %v648_v3  ;;  %v3448_v2 = vsub.f32 %v324_v5, %v3435_v51 }
  0x44   : > { %2636 = vmatprep.mubr.f32.mxu1 %v600_v48  ;;  %2795 = vmatprep.mubr.f32.mxu0 %v618_v61  ;;  %v3443_v61 = vand.u32 4294901760, %v327_v1  ;;  %v659_v48 = vsub.f32 %v3416_v56, %v658_v21 }
  0x45   : > { %v698_v38 = vand.u32 4294901760, %v3448_v2 }
  0x46   : > { %v3453_v55 = vsub.f32 %v327_v1, %v3443_v61 }
  0x47   : > { %2637 = vmatmul.mubr.f32.gmra.mrb[20].mxu1 %v610_v47  ;;  %2796 = vmatmul.mubr.f32.gmra.mrb[22].mxu0 %v628_v31  ;;  %v650_v31 = vand.u32 4294901760, %v649_v6  ;;  %v669_v47 = vsub.f32 %v3427_v32, %v668_v39  ;;  %v699_v1 = vsub.f32 %v3448_v2, %v698_v38 }
  0x48   : > { %2639 = vmatprep.mubr.f32.mxu1 %v620_v63  ;;  %2798 = vmatprep.mubr.f32.mxu0 %v638_v54  ;;  %v660_v63 = vand.u32 4294901760, %v659_v48  ;;  %v679_v54 = vsub.f32 %v3433_v58, %v678_v42 }
  0x49   : > { %v670_v5 = vand.u32 4294901760, %v669_v47  ;;  %v700_v48 = vand.u32 4294901760, %v699_v1 }
  0x4a   : > { %v680_v6 = vand.u32 4294901760, %v679_v54 }
  0x4b   : > { %2640 = vmatmul.mubr.f32.gmra.mrb[22].mxu1 %v630_v10  ;;  %2799 = vmatmul.mubr.f32.gmra.mrb[24].mxu0 %v648_v3  ;;  %v689_v3 = vsub.f32 %v3441_v11, %v688_v37  ;;  %v708_v10 = vand.u32 4294901760, %v3453_v55 }
  0x4c   : > { %2642 = vmatprep.mubr.f32.mxu1 %v640_v25  ;;  %2801 = vmatprep.mubr.f32.mxu0 %v658_v21 }
  0x4d   : > { %v690_v21 = vand.u32 4294901760, %v689_v3  ;;  %v709_v25 = vsub.f32 %v3453_v55, %v708_v10 }
  0x4f   : > { %2643 = vmatmul.mubr.f32.gmra.mrb[24].mxu1 %v650_v31  ;;  %2802 = vmatmul.mubr.f32.gmra.mrb[26].mxu0 %v668_v39  ;;  %v710_v39 = vand.u32 4294901760, %v709_v25 }
  0x50   : > { %2645 = vmatprep.mubr.f32.mxu1 %v660_v63  ;;  %2804 = vmatprep.mubr.f32.mxu0 %v678_v42 }
  0x53   : > { %2646 = vmatmul.mubr.f32.gmra.mrb[26].mxu1 %v670_v5  ;;  %2805 = vmatmul.mubr.f32.gmra.mrb[28].mxu0 %v688_v37 }
  0x54   : > { %2648 = vmatprep.mubr.f32.mxu1 %v680_v6  ;;  %2807 = vmatprep.mubr.f32.mxu0 %v698_v38 }
  0x57   : > { %2649 = vmatmul.mubr.f32.gmra.mrb[28].mxu1 %v690_v21  ;;  %2808 = vmatmul.mubr.f32.gmra.mrb[30].mxu0 %v708_v10 }
  0x58   : > { %2651 = vmatprep.mubr.f32.mxu1 %v700_v48  ;;  %2814 = vmatprep.mubr.f32.mxu0 %v3178_v19 }
  0x5b   : > { %2652 = vmatmul.mubr.f32.gmra.mrb[30].mxu1 %v710_v39  ;;  %2815 = vmatmul.mubr.f32.vlgmr.msra.gmra.mrb[0].mxu0 %v3180_v20 }
  0x5c   : > { %2658 = vmatprep.mubr.f32.mxu1 %v3178_v19  ;;  %2817 = vmatprep.mubr.f32.mxu0 %v3184_v26 }
  0x5d   : > { %2937 = vmatpush3.bf16.msra.mxu0 %v3155_v4  ;;  %v3780_v4 = vld [vmem:[#allocation2_spill] sm:$0xff] }
  0x5f   : > { %2659 = vmatmul.mubr.f32.vlgmr.msra.gmra.mrb[0].mxu1 %v3180_v20  ;;  %2818 = vmatmul.mubr.f32.gmra.mrb[2].mxu0 %v3193_v30 }
  0x60   : > { %2925 = vmatpush3.bf16.msra.mxu1 %v3172_v12  ;;  %2661 = vmatprep.mubr.f32.mxu1 %v3184_v26  ;;  %v3781_v12 = vld [vmem:[#allocation3_spill] sm:$0xff] }
  0x61   : > { %2820 = vmatprep.mubr.f32.mxu0 %v3201_v36 }
  0x63   : > { %2662 = vmatmul.mubr.f32.gmra.mrb[2].mxu1 %v3193_v30  ;;  %2821 = vmatmul.mubr.f32.gmra.mrb[4].mxu0 %v3209_v41 }
  0x64   : > { %2664 = vmatprep.mubr.f32.mxu1 %v3201_v36  ;;  %2823 = vmatprep.mubr.f32.mxu0 %v3225_v52 }
  0x67   : > { %2665 = vmatmul.mubr.f32.gmra.mrb[4].mxu1 %v3209_v41  ;;  %2824 = vmatmul.mubr.f32.gmra.mrb[6].mxu0 %v3227_v53 }
  0x68   : > { %2667 = vmatprep.mubr.f32.mxu1 %v3225_v52  ;;  %2826 = vmatprep.mubr.f32.mxu0 %v3248_v9 }
  0x6b   : > { %2668 = vmatmul.mubr.f32.gmra.mrb[6].mxu1 %v3227_v53  ;;  %2827 = vmatmul.mubr.f32.gmra.mrb[8].mxu0 %v3252_v14 }
  0x6c   : > { %2670 = vmatprep.mubr.f32.mxu1 %v3248_v9  ;;  %2829 = vmatprep.mubr.f32.mxu0 %v3260_v22 }
  0x6f   : > { %2671 = vmatmul.mubr.f32.gmra.mrb[8].mxu1 %v3252_v14  ;;  %2830 = vmatmul.mubr.f32.gmra.mrb[10].mxu0 %v3266_v24 }
  0x70   : > { %2673 = vmatprep.mubr.f32.mxu1 %v3260_v22  ;;  %2832 = vmatprep.mubr.f32.mxu0 %v3281_v44 }
  0x73   : > { %2674 = vmatmul.mubr.f32.gmra.mrb[10].mxu1 %v3266_v24  ;;  %2833 = vmatmul.mubr.f32.gmra.mrb[12].mxu0 %v3283_v45 }
  0x74   : > { %2676 = vmatprep.mubr.f32.mxu1 %v3281_v44  ;;  %2835 = vmatprep.mubr.f32.mxu0 %v3298_v59 }
  0x77   : > { %2677 = vmatmul.mubr.f32.gmra.mrb[12].mxu1 %v3283_v45  ;;  %2836 = vmatmul.mubr.f32.gmra.mrb[14].mxu0 %v3300_v60 }
  0x78   : > { %2679 = vmatprep.mubr.f32.mxu1 %v3298_v59  ;;  %2838 = vmatprep.mubr.f32.mxu0 %v3315_v13 }
  0x7b   : > { %2680 = vmatmul.mubr.f32.gmra.mrb[14].mxu1 %v3300_v60  ;;  %2839 = vmatmul.mubr.f32.gmra.mrb[16].mxu0 %v3326_v33 }
  0x7c   : > { %2682 = vmatprep.mubr.f32.mxu1 %v3315_v13  ;;  %2841 = vmatprep.mubr.f32.mxu0 %v3328_v34 }
  0x7f   : > { %2683 = vmatmul.mubr.f32.gmra.mrb[16].mxu1 %v3326_v33  ;;  %2842 = vmatmul.mubr.f32.gmra.mrb[18].mxu0 %v3340_v0 }
  0x80   : > { %2685 = vmatprep.mubr.f32.mxu1 %v3328_v34  ;;  %2844 = vmatprep.mubr.f32.mxu0 %v3346_v7 }
  0x83   : > { %2686 = vmatmul.mubr.f32.gmra.mrb[18].mxu1 %v3340_v0  ;;  %2845 = vmatmul.mubr.f32.gmra.mrb[20].mxu0 %v3351_v16 }
  0x84   : > { %2688 = vmatprep.mubr.f32.mxu1 %v3346_v7  ;;  %2847 = vmatprep.mubr.f32.mxu0 %v3353_v18 }
  0x87   : > { %2689 = vmatmul.mubr.f32.gmra.mrb[20].mxu1 %v3351_v16  ;;  %2848 = vmatmul.mubr.f32.gmra.mrb[22].mxu0 %v3375_v57 }
  0x88   : > { %2691 = vmatprep.mubr.f32.mxu1 %v3353_v18  ;;  %2850 = vmatprep.mubr.f32.mxu0 %v3380_v27 }
  0x8b   : > { %2692 = vmatmul.mubr.f32.gmra.mrb[22].mxu1 %v3375_v57  ;;  %2851 = vmatmul.mubr.f32.gmra.mrb[24].mxu0 %v3397_v17 }
  0x8c   : > { %2694 = vmatprep.mubr.f32.mxu1 %v3380_v27  ;;  %2853 = vmatprep.mubr.f32.mxu0 %v3400_v23 }
  0x8f   : > { %2695 = vmatmul.mubr.f32.gmra.mrb[24].mxu1 %v3397_v17  ;;  %2854 = vmatmul.mubr.f32.gmra.mrb[26].mxu0 %v3413_v50 }
  0x90   : > { %2697 = vmatprep.mubr.f32.mxu1 %v3400_v23  ;;  %2856 = vmatprep.mubr.f32.mxu0 %v3418_v46 }
  0x93   : > { %2698 = vmatmul.mubr.f32.gmra.mrb[26].mxu1 %v3413_v50  ;;  %2857 = vmatmul.mubr.f32.gmra.mrb[28].mxu0 %v3429_v15 }
  0x94   : > { %2700 = vmatprep.mubr.f32.mxu1 %v3418_v46  ;;  %2859 = vmatprep.mubr.f32.mxu0 %v3435_v51 }
  0x97   : > { %2701 = vmatmul.mubr.f32.gmra.mrb[28].mxu1 %v3429_v15  ;;  %2860 = vmatmul.mubr.f32.gmra.mrb[30].mxu0 %v3443_v61 }
  0x98   : > { %2703 = vmatprep.mubr.f32.mxu1 %v3435_v51  ;;  %2866 = vmatprep.mubr.f32.mxu0 %v3178_v19  ;;  %v3782_v19 = vld [vmem:[#allocation4_spill] sm:$0xff] }
  0x9b   : > { %2704 = vmatmul.mubr.f32.gmra.mrb[30].mxu1 %v3443_v61  ;;  %2867 = vmatmul.mubr.f32.vlgmr.msra.gmra.mrb[0].mxu0 %v3180_v20  ;;  %v3783_v20 = vld [vmem:[#allocation5_spill] sm:$0xff] }
  0x9c   : > { %2710 = vmatprep.mubr.f32.mxu1 %v3188_v28  ;;  %2869 = vmatprep.mubr.f32.mxu0 %v3184_v26  ;;  %v3784_v26 = vld [vmem:[#allocation6_spill] sm:$0xff]  ;;  %v3785_v28 = vld [vmem:[#allocation7_spill] sm:$0xff] }
  0x9f   : > { %2711 = vmatmul.mubr.f32.vlgmr.msra.gmra.mrb[0].mxu1 %v3191_v29  ;;  %2870 = vmatmul.mubr.f32.gmra.mrb[2].mxu0 %v3193_v30  ;;  %v3786_v29 = vld [vmem:[#allocation8_spill] sm:$0xff]  ;;  %v3787_v30 = vld [vmem:[#allocation9_spill] sm:$0xff] }
  0xa0   : > { %2713 = vmatprep.mubr.f32.mxu1 %v3199_v35  ;;  %2872 = vmatprep.mubr.f32.mxu0 %v3201_v36  ;;  %v3788_v35 = vld [vmem:[#allocation10_spill] sm:$0xff]  ;;  %v3789_v36 = vld [vmem:[#allocation11_spill] sm:$0xff] }
  0xa3   : > { %2714 = vmatmul.mubr.f32.gmra.mrb[2].mxu1 %v3207_v40  ;;  %2873 = vmatmul.mubr.f32.gmra.mrb[4].mxu0 %v3209_v41  ;;  %v3790_v40 = vld [vmem:[#allocation12_spill] sm:$0xff]  ;;  %v3791_v41 = vld [vmem:[#allocation13_spill] sm:$0xff] }
  0xa4   : > { %2716 = vmatprep.mubr.f32.mxu1 %v3213_v43  ;;  %2875 = vmatprep.mubr.f32.mxu0 %v3225_v52  ;;  %v3792_v43 = vld [vmem:[#allocation14_spill] sm:$0xff]  ;;  %v3794_v52 = vld [vmem:[#allocation16_spill] sm:$0xff] }
  0xa7   : > { %2717 = vmatmul.mubr.f32.gmra.mrb[4].mxu1 %v3221_v49  ;;  %2876 = vmatmul.mubr.f32.gmra.mrb[6].mxu0 %v3227_v53  ;;  %v3793_v49 = vld [vmem:[#allocation15_spill] sm:$0xff]  ;;  %v3795_v53 = vld [vmem:[#allocation17_spill] sm:$0xff] }
  0xa8   : > { %2719 = vmatprep.mubr.f32.mxu1 %v3235_v62  ;;  %2878 = vmatprep.mubr.f32.mxu0 %v3248_v9  ;;  %v3796_v62 = vld [vmem:[#allocation18_spill] sm:$0xff]  ;;  %v3797_v9 = vld [vmem:[#allocation19_spill] sm:$0xff] }
  0xab   : > { %2720 = vmatmul.mubr.f32.gmra.mrb[6].mxu1 %v3780_v4  ;;  %2879 = vmatmul.mubr.f32.gmra.mrb[8].mxu0 %v3252_v14 }
  0xac   : > { %2722 = vmatprep.mubr.f32.mxu1 %v3781_v12  ;;  %2881 = vmatprep.mubr.f32.mxu0 %v3260_v22 }
  0xaf   : > { %2723 = vmatmul.mubr.f32.gmra.mrb[8].mxu1 %v3782_v19  ;;  %2882 = vmatmul.mubr.f32.gmra.mrb[10].mxu0 %v3266_v24  ;;  %v3594_v24 = vld [vmem:[%s3741_s2] ss:$0 sm:$0xff] }
  0xb0   : > { %2725 = vmatprep.mubr.f32.mxu1 %v3783_v20  ;;  %2884 = vmatprep.mubr.f32.mxu0 %v3281_v44 }
  0xb3   : > { %2726 = vmatmul.mubr.f32.gmra.mrb[10].mxu1 %v3784_v26  ;;  %2885 = vmatmul.mubr.f32.gmra.mrb[12].mxu0 %v3283_v45 }
  0xb4   : > { %2728 = vmatprep.mubr.f32.mxu1 %v3785_v28  ;;  %2887 = vmatprep.mubr.f32.mxu0 %v3298_v59  ;;  %v3599_v59 = vld [vmem:[%s3742_s3] ss:$0 sm:$0xff] }
  0xb7   : > { %2729 = vmatmul.mubr.f32.gmra.mrb[12].mxu1 %v3786_v29  ;;  %2888 = vmatmul.mubr.f32.gmra.mrb[14].mxu0 %v3300_v60 }
  0xb8   : > { %2731 = vmatprep.mubr.f32.mxu1 %v3787_v30  ;;  %2890 = vmatprep.mubr.f32.mxu0 %v3315_v13 }
  0xbb   : > { %2732 = vmatmul.mubr.f32.gmra.mrb[14].mxu1 %v3788_v35  ;;  %2891 = vmatmul.mubr.f32.gmra.mrb[16].mxu0 %v3326_v33 }
  0xbc   : > { %2734 = vmatprep.mubr.f32.mxu1 %v3789_v36  ;;  %2893 = vmatprep.mubr.f32.mxu0 %v3328_v34 }
  0xbf   : > { %2735 = vmatmul.mubr.f32.gmra.mrb[16].mxu1 %v3790_v40  ;;  %2894 = vmatmul.mubr.f32.gmra.mrb[18].mxu0 %v3340_v0 }
  0xc0   : > { %2737 = vmatprep.mubr.f32.mxu1 %v3791_v41  ;;  %2896 = vmatprep.mubr.f32.mxu0 %v3346_v7 }
  0xc3   : > { %2738 = vmatmul.mubr.f32.gmra.mrb[18].mxu1 %v3792_v43  ;;  %2897 = vmatmul.mubr.f32.gmra.mrb[20].mxu0 %v3351_v16 }
  0xc4   : > { %2740 = vmatprep.mubr.f32.mxu1 %v3793_v49  ;;  %2899 = vmatprep.mubr.f32.mxu0 %v3353_v18 }
  0xc7   : > { %2741 = vmatmul.mubr.f32.gmra.mrb[20].mxu1 %v3794_v52  ;;  %2900 = vmatmul.mubr.f32.gmra.mrb[22].mxu0 %v3375_v57 }
  0xc8   : > { %2743 = vmatprep.mubr.f32.mxu1 %v3795_v53  ;;  %2902 = vmatprep.mubr.f32.mxu0 %v3380_v27 }
  0xcb   : > { %2744 = vmatmul.mubr.f32.gmra.mrb[22].mxu1 %v3796_v62  ;;  %2903 = vmatmul.mubr.f32.gmra.mrb[24].mxu0 %v3397_v17 }
  0xcc   : > { %2746 = vmatprep.mubr.f32.mxu1 %v3797_v9  ;;  %2905 = vmatprep.mubr.f32.mxu0 %v3400_v23 }
  0xcf   : > { %2747 = vmatmul.mubr.f32.gmra.mrb[24].mxu1 %v3411_v8  ;;  %2906 = vmatmul.mubr.f32.gmra.mrb[26].mxu0 %v3413_v50 }
  0xd0   : > { %2749 = vmatprep.mubr.f32.mxu1 %v3416_v56  ;;  %2908 = vmatprep.mubr.f32.mxu0 %v3418_v46 }
  0xd3   : > { %2750 = vmatmul.mubr.f32.gmra.mrb[26].mxu1 %v3427_v32  ;;  %2909 = vmatmul.mubr.f32.gmra.mrb[28].mxu0 %v3429_v15 }
  0xd4   : > { %2752 = vmatprep.mubr.f32.mxu1 %v3433_v58  ;;  %2911 = vmatprep.mubr.f32.mxu0 %v3435_v51 }
  0xd7   : > { %2753 = vmatmul.mubr.f32.gmra.mrb[28].mxu1 %v3441_v11  ;;  %2912 = vmatmul.mubr.f32.gmra.mrb[30].mxu0 %v3443_v61 }
  0xd8   : > { %2755 = vmatprep.mubr.f32.mxu1 %v3448_v2 }
  0xdb   : > { %2756 = vmatmul.mubr.f32.gmra.mrb[30].mxu1 %v3453_v55 }
 0x16e   : > { %v2868_v14 = vpop.f32.mrb[0].mxu0 }
 0x16f   : > { %v1931_v22 = vpop.f32.mrb[1].mxu0 }
 0x172   : > { %v2712_v23 = vpop.f32.mrb[0].mxu1  ;;  %v2871_v42 = vpop.f32.mrb[2].mxu0 }
 0x173   : > { %v2938_v44 = vadd.f32 %v2868_v14, %v2712_v23  ;;  %v1055_v45 = vpop.f32.mrb[1].mxu1  ;;  %v1943_v56 = vpop.f32.mrb[3].mxu0 }
 0x174   : > { %v2939_v60 = vadd.f32 %v1931_v22, %v1055_v45 }
 0x175   : > { %v2129_v13 = vmul.f32 %v2938_v44, %v3594_v24 }
 0x176   : > { %v2128_v33 = vmul.f32 %v2939_v60, %v3594_v24  ;;  %v2715_v34 = vpop.f32.mrb[2].mxu1  ;;  %v2874_v0 = vpop.f32.mrb[4].mxu0 }
 0x177   : > { %v2168_v7 = vadd.f32 %v3599_v59, %v2129_v13  ;;  %v2940_v16 = vadd.f32 %v2871_v42, %v2715_v34  ;;  %v1069_v18 = vpop.f32.mrb[3].mxu1  ;;  %v1955_v46 = vpop.f32.mrb[5].mxu0 }
 0x178   : > { %v2167_v57 = vadd.f32 %v3599_v59, %v2128_v33  ;;  %v2941_v27 = vadd.f32 %v1943_v56, %v1069_v18 }
 0x179   : > { %vm2200_vm1 = vcmp.gt.f32.partialorder %v2168_v7, 0.0  ;;  %v2232_v11 = vmul.f32 0.1, %v2168_v7  ;;  %v2131_v17 = vmul.f32 %v2940_v16, %v3594_v24 }
 0x17a   : > { %vm2199_vm3 = vcmp.gt.f32.partialorder %v2167_v57, 0.0  ;;  %v2231_v8 = vmul.f32 0.1, %v2167_v57  ;;  %v2130_v50 = vmul.f32 %v2941_v27, %v3594_v24  ;;  %v2718_v32 = vpop.f32.mrb[4].mxu1  ;;  %v2877_v15 = vpop.f32.mrb[6].mxu0 }
 0x17b   : > { %v2264_v58 = vsel %vm2200_vm1, %v2168_v7, %v2232_v11  ;;  %v2170_v51 = vadd.f32 %v3599_v59, %v2131_v17  ;;  %v2942_v61 = vadd.f32 %v2874_v0, %v2718_v32  ;;  %v1083_v2 = vpop.f32.mrb[5].mxu1  ;;  %v1967_v31 = vpop.f32.mrb[7].mxu0 }
 0x17c   : > { %2297 = vst.msk [vmem:[%s3610_s5 + $0x8] sm:$0xff] %vm2295_vm2, %v2264_v58  ;;  %v2263_v47 = vsel %vm2199_vm3, %v2167_v57, %v2231_v8  ;;  %v2169_v37 = vadd.f32 %v3599_v59, %v2130_v50  ;;  %v2943_v55 = vadd.f32 %v1955_v46, %v1083_v2 }
 0x17d   : > { %2296 = vst.msk [vmem:[%s3610_s5] sm:$0xff] %vm2295_vm2, %v2263_v47  ;;  %vm2202_vm4 = vcmp.gt.f32.partialorder %v2170_v51, 0.0  ;;  %v2234_v63 = vmul.f32 0.1, %v2170_v51  ;;  %v2133_v54 = vmul.f32 %v2942_v61, %v3594_v24 }
 0x17e   : > { %vm2201_vm5 = vcmp.gt.f32.partialorder %v2169_v37, 0.0  ;;  %v2233_v38 = vmul.f32 0.1, %v2169_v37  ;;  %v2132_v5 = vmul.f32 %v2943_v55, %v3594_v24  ;;  %v2721_v3 = vpop.f32.mrb[6].mxu1  ;;  %v2880_v10 = vpop.f32.mrb[8].mxu0 }
 0x17f   : > { %v2266_v6 = vsel %vm2202_vm4, %v2170_v51, %v2234_v63  ;;  %v2172_v1 = vadd.f32 %v3599_v59, %v2133_v54  ;;  %v2944_v21 = vadd.f32 %v2877_v15, %v2721_v3  ;;  %v1097_v25 = vpop.f32.mrb[7].mxu1  ;;  %v1979_v48 = vpop.f32.mrb[9].mxu0 }
 0x180   : > { %2299 = vst.msk [vmem:[%s3610_s5 + $0x18] sm:$0xff] %vm2295_vm2, %v2266_v6  ;;  %v2265_v39 = vsel %vm2201_vm5, %v2169_v37, %v2233_v38  ;;  %v2171_v4 = vadd.f32 %v3599_v59, %v2132_v5  ;;  %v2945_v12 = vadd.f32 %v1967_v31, %v1097_v25 }
 0x181   : > { %2298 = vst.msk [vmem:[%s3610_s5 + $0x10] sm:$0xff] %vm2295_vm2, %v2265_v39  ;;  %vm2204_vm6 = vcmp.gt.f32.partialorder %v2172_v1, 0.0  ;;  %v2236_v19 = vmul.f32 0.1, %v2172_v1  ;;  %v2135_v20 = vmul.f32 %v2944_v21, %v3594_v24 }
 0x182   : > { %vm2203_vm7 = vcmp.gt.f32.partialorder %v2171_v4, 0.0  ;;  %v2235_v26 = vmul.f32 0.1, %v2171_v4  ;;  %v2134_v28 = vmul.f32 %v2945_v12, %v3594_v24  ;;  %v2724_v29 = vpop.f32.mrb[8].mxu1  ;;  %v2883_v30 = vpop.f32.mrb[10].mxu0 }
 0x183   : > { %v2268_v35 = vsel %vm2204_vm6, %v2172_v1, %v2236_v19  ;;  %v2174_v36 = vadd.f32 %v3599_v59, %v2135_v20  ;;  %v2946_v40 = vadd.f32 %v2880_v10, %v2724_v29  ;;  %v1111_v41 = vpop.f32.mrb[9].mxu1  ;;  %v1991_v43 = vpop.f32.mrb[11].mxu0 }
 0x184   : > { %2301 = vst.msk [vmem:[%s3610_s5 + $0x28] sm:$0xff] %vm2295_vm2, %v2268_v35  ;;  %v2267_v49 = vsel %vm2203_vm7, %v2171_v4, %v2235_v26  ;;  %v2173_v52 = vadd.f32 %v3599_v59, %v2134_v28  ;;  %v2947_v53 = vadd.f32 %v1979_v48, %v1111_v41 }
 0x185   : > { %2300 = vst.msk [vmem:[%s3610_s5 + $0x20] sm:$0xff] %vm2295_vm2, %v2267_v49  ;;  %vm2206_vm8 = vcmp.gt.f32.partialorder %v2174_v36, 0.0  ;;  %v2238_v62 = vmul.f32 0.1, %v2174_v36  ;;  %v2137_v9 = vmul.f32 %v2946_v40, %v3594_v24 }
 0x186   : > { %vm2205_vm9 = vcmp.gt.f32.partialorder %v2173_v52, 0.0  ;;  %v2237_v14 = vmul.f32 0.1, %v2173_v52  ;;  %v2136_v22 = vmul.f32 %v2947_v53, %v3594_v24  ;;  %v2727_v23 = vpop.f32.mrb[10].mxu1  ;;  %v2886_v42 = vpop.f32.mrb[12].mxu0 }
 0x187   : > { %v2270_v44 = vsel %vm2206_vm8, %v2174_v36, %v2238_v62  ;;  %v2176_v45 = vadd.f32 %v3599_v59, %v2137_v9  ;;  %v2948_v56 = vadd.f32 %v2883_v30, %v2727_v23  ;;  %v1125_v60 = vpop.f32.mrb[11].mxu1  ;;  %v2003_v13 = vpop.f32.mrb[13].mxu0 }
 0x188   : > { %2303 = vst.msk [vmem:[%s3610_s5 + $0x38] sm:$0xff] %vm2295_vm2, %v2270_v44  ;;  %v2269_v33 = vsel %vm2205_vm9, %v2173_v52, %v2237_v14  ;;  %v2175_v34 = vadd.f32 %v3599_v59, %v2136_v22  ;;  %v2949_v0 = vadd.f32 %v1991_v43, %v1125_v60 }
 0x189   : > { %2302 = vst.msk [vmem:[%s3610_s5 + $0x30] sm:$0xff] %vm2295_vm2, %v2269_v33  ;;  %vm2208_vm10 = vcmp.gt.f32.partialorder %v2176_v45, 0.0  ;;  %v2240_v7 = vmul.f32 0.1, %v2176_v45  ;;  %v2139_v16 = vmul.f32 %v2948_v56, %v3594_v24 }
 0x18a   : > { %vm2207_vm11 = vcmp.gt.f32.partialorder %v2175_v34, 0.0  ;;  %v2239_v18 = vmul.f32 0.1, %v2175_v34  ;;  %v2138_v46 = vmul.f32 %v2949_v0, %v3594_v24  ;;  %v2730_v57 = vpop.f32.mrb[12].mxu1  ;;  %v2889_v27 = vpop.f32.mrb[14].mxu0 }
 0x18b   : > { %v2272_v11 = vsel %vm2208_vm10, %v2176_v45, %v2240_v7  ;;  %v2178_v17 = vadd.f32 %v3599_v59, %v2139_v16  ;;  %v2950_v8 = vadd.f32 %v2886_v42, %v2730_v57  ;;  %v1139_v50 = vpop.f32.mrb[13].mxu1  ;;  %v2015_v32 = vpop.f32.mrb[15].mxu0 }
 0x18c   : > { %2305 = vst.msk [vmem:[%s3610_s5 + $0x48] sm:$0xff] %vm2295_vm2, %v2272_v11  ;;  %v2271_v15 = vsel %vm2207_vm11, %v2175_v34, %v2239_v18  ;;  %v2177_v58 = vadd.f32 %v3599_v59, %v2138_v46  ;;  %v2951_v51 = vadd.f32 %v2003_v13, %v1139_v50 }
 0x18d   : > { %2304 = vst.msk [vmem:[%s3610_s5 + $0x40] sm:$0xff] %vm2295_vm2, %v2271_v15  ;;  %vm2210_vm12 = vcmp.gt.f32.partialorder %v2178_v17, 0.0  ;;  %v2242_v61 = vmul.f32 0.1, %v2178_v17  ;;  %v2141_v2 = vmul.f32 %v2950_v8, %v3594_v24 }
 0x18e   : > { %vm2209_vm13 = vcmp.gt.f32.partialorder %v2177_v58, 0.0  ;;  %v2241_v31 = vmul.f32 0.1, %v2177_v58  ;;  %v2140_v47 = vmul.f32 %v2951_v51, %v3594_v24  ;;  %v2733_v37 = vpop.f32.mrb[14].mxu1  ;;  %v2892_v55 = vpop.f32.mrb[16].mxu0 }
 0x18f   : > { %v2274_v63 = vsel %vm2210_vm12, %v2178_v17, %v2242_v61  ;;  %v2180_v54 = vadd.f32 %v3599_v59, %v2141_v2  ;;  %v2952_v38 = vadd.f32 %v2889_v27, %v2733_v37  ;;  %v1153_v5 = vpop.f32.mrb[15].mxu1  ;;  %v2027_v3 = vpop.f32.mrb[17].mxu0 }
 0x190   : > { %2307 = vst.msk [vmem:[%s3610_s5 + $0x58] sm:$0xff] %vm2295_vm2, %v2274_v63  ;;  %v2273_v10 = vsel %vm2209_vm13, %v2177_v58, %v2241_v31  ;;  %v2179_v6 = vadd.f32 %v3599_v59, %v2140_v47  ;;  %v2953_v1 = vadd.f32 %v2015_v32, %v1153_v5 }
 0x191   : > { %2306 = vst.msk [vmem:[%s3610_s5 + $0x50] sm:$0xff] %vm2295_vm2, %v2273_v10  ;;  %vm2212_vm14 = vcmp.gt.f32.partialorder %v2180_v54, 0.0  ;;  %v2244_v21 = vmul.f32 0.1, %v2180_v54  ;;  %v2143_v25 = vmul.f32 %v2952_v38, %v3594_v24 }
 0x192   : > { %vm2211_vm15 = vcmp.gt.f32.partialorder %v2179_v6, 0.0  ;;  %v2243_v48 = vmul.f32 0.1, %v2179_v6  ;;  %v2142_v39 = vmul.f32 %v2953_v1, %v3594_v24  ;;  %v2736_v4 = vpop.f32.mrb[16].mxu1  ;;  %v2895_v12 = vpop.f32.mrb[18].mxu0 }
 0x193   : > { %v2276_v19 = vsel %vm2212_vm14, %v2180_v54, %v2244_v21  ;;  %v2182_v20 = vadd.f32 %v3599_v59, %v2143_v25  ;;  %v2954_v26 = vadd.f32 %v2892_v55, %v2736_v4  ;;  %v1167_v28 = vpop.f32.mrb[17].mxu1  ;;  %v2039_v29 = vpop.f32.mrb[19].mxu0 }
 0x194   : > { %2309 = vst.msk [vmem:[%s3610_s5 + $0x68] sm:$0xff] %vm2295_vm2, %v2276_v19  ;;  %v2275_v30 = vsel %vm2211_vm15, %v2179_v6, %v2243_v48  ;;  %v2181_v35 = vadd.f32 %v3599_v59, %v2142_v39  ;;  %v2955_v36 = vadd.f32 %v2027_v3, %v1167_v28 }
 0x195   : > { %2308 = vst.msk [vmem:[%s3610_s5 + $0x60] sm:$0xff] %vm2295_vm2, %v2275_v30  ;;  %vm2214_vm0 = vcmp.gt.f32.partialorder %v2182_v20, 0.0  ;;  %v2246_v40 = vmul.f32 0.1, %v2182_v20  ;;  %v2145_v41 = vmul.f32 %v2954_v26, %v3594_v24 }
 0x196   : > { %vm2213_vm1 = vcmp.gt.f32.partialorder %v2181_v35, 0.0  ;;  %v2245_v43 = vmul.f32 0.1, %v2181_v35  ;;  %v2144_v49 = vmul.f32 %v2955_v36, %v3594_v24  ;;  %v2739_v52 = vpop.f32.mrb[18].mxu1  ;;  %v2898_v53 = vpop.f32.mrb[20].mxu0 }
 0x197   : > { %v2278_v62 = vsel %vm2214_vm0, %v2182_v20, %v2246_v40  ;;  %v2184_v9 = vadd.f32 %v3599_v59, %v2145_v41  ;;  %v2956_v14 = vadd.f32 %v2895_v12, %v2739_v52  ;;  %v1181_v22 = vpop.f32.mrb[19].mxu1  ;;  %v2051_v23 = vpop.f32.mrb[21].mxu0 }
 0x198   : > { %2311 = vst.msk [vmem:[%s3610_s5 + $0x78] sm:$0xff] %vm2295_vm2, %v2278_v62  ;;  %v2277_v42 = vsel %vm2213_vm1, %v2181_v35, %v2245_v43  ;;  %v2183_v44 = vadd.f32 %v3599_v59, %v2144_v49  ;;  %v2957_v45 = vadd.f32 %v2039_v29, %v1181_v22 }
 0x199   : > { %2310 = vst.msk [vmem:[%s3610_s5 + $0x70] sm:$0xff] %vm2295_vm2, %v2277_v42  ;;  %vm2216_vm3 = vcmp.gt.f32.partialorder %v2184_v9, 0.0  ;;  %v2248_v56 = vmul.f32 0.1, %v2184_v9  ;;  %v2147_v60 = vmul.f32 %v2956_v14, %v3594_v24 }
 0x19a   : > { %vm2215_vm4 = vcmp.gt.f32.partialorder %v2183_v44, 0.0  ;;  %v2247_v13 = vmul.f32 0.1, %v2183_v44  ;;  %v2146_v33 = vmul.f32 %v2957_v45, %v3594_v24  ;;  %v2742_v34 = vpop.f32.mrb[20].mxu1  ;;  %v2901_v0 = vpop.f32.mrb[22].mxu0 }
 0x19b   : > { %v2280_v7 = vsel %vm2216_vm3, %v2184_v9, %v2248_v56  ;;  %v2186_v16 = vadd.f32 %v3599_v59, %v2147_v60  ;;  %v2958_v18 = vadd.f32 %v2898_v53, %v2742_v34  ;;  %v1195_v46 = vpop.f32.mrb[21].mxu1  ;;  %v2063_v57 = vpop.f32.mrb[23].mxu0 }
 0x19c   : > { %2313 = vst.msk [vmem:[%s3610_s5 + $0x88] sm:$0xff] %vm2295_vm2, %v2280_v7  ;;  %v2279_v27 = vsel %vm2215_vm4, %v2183_v44, %v2247_v13  ;;  %v2185_v11 = vadd.f32 %v3599_v59, %v2146_v33  ;;  %v2959_v17 = vadd.f32 %v2051_v23, %v1195_v46 }
 0x19d   : > { %2312 = vst.msk [vmem:[%s3610_s5 + $0x80] sm:$0xff] %vm2295_vm2, %v2279_v27  ;;  %vm2218_vm5 = vcmp.gt.f32.partialorder %v2186_v16, 0.0  ;;  %v2250_v8 = vmul.f32 0.1, %v2186_v16  ;;  %v2149_v50 = vmul.f32 %v2958_v18, %v3594_v24 }
 0x19e   : > { %vm2217_vm6 = vcmp.gt.f32.partialorder %v2185_v11, 0.0  ;;  %v2249_v32 = vmul.f32 0.1, %v2185_v11  ;;  %v2148_v15 = vmul.f32 %v2959_v17, %v3594_v24  ;;  %v2745_v58 = vpop.f32.mrb[22].mxu1  ;;  %v2904_v51 = vpop.f32.mrb[24].mxu0 }
 0x19f   : > { %v2282_v61 = vsel %vm2218_vm5, %v2186_v16, %v2250_v8  ;;  %v2188_v2 = vadd.f32 %v3599_v59, %v2149_v50  ;;  %v2960_v31 = vadd.f32 %v2901_v0, %v2745_v58  ;;  %v1209_v47 = vpop.f32.mrb[23].mxu1  ;;  %v2075_v37 = vpop.f32.mrb[25].mxu0 }
 0x1a0   : > { %2315 = vst.msk [vmem:[%s3610_s5 + $0x98] sm:$0xff] %vm2295_vm2, %v2282_v61  ;;  %v2281_v55 = vsel %vm2217_vm6, %v2185_v11, %v2249_v32  ;;  %v2187_v63 = vadd.f32 %v3599_v59, %v2148_v15  ;;  %v2961_v54 = vadd.f32 %v2063_v57, %v1209_v47 }
 0x1a1   : > { %2314 = vst.msk [vmem:[%s3610_s5 + $0x90] sm:$0xff] %vm2295_vm2, %v2281_v55  ;;  %vm2220_vm7 = vcmp.gt.f32.partialorder %v2188_v2, 0.0  ;;  %v2252_v38 = vmul.f32 0.1, %v2188_v2  ;;  %v2151_v5 = vmul.f32 %v2960_v31, %v3594_v24 }
 0x1a2   : > { %vm2219_vm8 = vcmp.gt.f32.partialorder %v2187_v63, 0.0  ;;  %v2251_v3 = vmul.f32 0.1, %v2187_v63  ;;  %v2150_v10 = vmul.f32 %v2961_v54, %v3594_v24  ;;  %v2748_v6 = vpop.f32.mrb[24].mxu1  ;;  %v2907_v1 = vpop.f32.mrb[26].mxu0 }
 0x1a3   : > { %v2284_v21 = vsel %vm2220_vm7, %v2188_v2, %v2252_v38  ;;  %v2190_v25 = vadd.f32 %v3599_v59, %v2151_v5  ;;  %v2962_v48 = vadd.f32 %v2904_v51, %v2748_v6  ;;  %v1223_v39 = vpop.f32.mrb[25].mxu1  ;;  %v2087_v4 = vpop.f32.mrb[27].mxu0 }
 0x1a4   : > { %2317 = vst.msk [vmem:[%s3610_s5 + $0xa8] sm:$0xff] %vm2295_vm2, %v2284_v21  ;;  %v2283_v12 = vsel %vm2219_vm8, %v2187_v63, %v2251_v3  ;;  %v2189_v19 = vadd.f32 %v3599_v59, %v2150_v10  ;;  %v2963_v20 = vadd.f32 %v2075_v37, %v1223_v39 }
 0x1a5   : > { %2316 = vst.msk [vmem:[%s3610_s5 + $0xa0] sm:$0xff] %vm2295_vm2, %v2283_v12  ;;  %vm2222_vm9 = vcmp.gt.f32.partialorder %v2190_v25, 0.0  ;;  %v2254_v26 = vmul.f32 0.1, %v2190_v25  ;;  %v2153_v28 = vmul.f32 %v2962_v48, %v3594_v24 }
 0x1a6   : > { %vm2221_vm10 = vcmp.gt.f32.partialorder %v2189_v19, 0.0  ;;  %v2253_v29 = vmul.f32 0.1, %v2189_v19  ;;  %v2152_v30 = vmul.f32 %v2963_v20, %v3594_v24  ;;  %v2751_v35 = vpop.f32.mrb[26].mxu1  ;;  %v2910_v36 = vpop.f32.mrb[28].mxu0 }
 0x1a7   : > { %v2286_v40 = vsel %vm2222_vm9, %v2190_v25, %v2254_v26  ;;  %v2192_v41 = vadd.f32 %v3599_v59, %v2153_v28  ;;  %v2964_v43 = vadd.f32 %v2907_v1, %v2751_v35  ;;  %v1237_v49 = vpop.f32.mrb[27].mxu1  ;;  %v2099_v52 = vpop.f32.mrb[29].mxu0 }
 0x1a8   : > { %2319 = vst.msk [vmem:[%s3610_s5 + $0xb8] sm:$0xff] %vm2295_vm2, %v2286_v40  ;;  %v2285_v53 = vsel %vm2221_vm10, %v2189_v19, %v2253_v29  ;;  %v2191_v62 = vadd.f32 %v3599_v59, %v2152_v30  ;;  %v2965_v9 = vadd.f32 %v2087_v4, %v1237_v49 }
 0x1a9   : > { %2318 = vst.msk [vmem:[%s3610_s5 + $0xb0] sm:$0xff] %vm2295_vm2, %v2285_v53  ;;  %vm2224_vm11 = vcmp.gt.f32.partialorder %v2192_v41, 0.0  ;;  %v2256_v14 = vmul.f32 0.1, %v2192_v41  ;;  %v2155_v22 = vmul.f32 %v2964_v43, %v3594_v24 }
 0x1aa   : > { %vm2223_vm12 = vcmp.gt.f32.partialorder %v2191_v62, 0.0  ;;  %v2255_v23 = vmul.f32 0.1, %v2191_v62  ;;  %v2154_v42 = vmul.f32 %v2965_v9, %v3594_v24  ;;  %v2754_v44 = vpop.f32.mrb[28].mxu1  ;;  %v2913_v45 = vpop.f32.mrb[30].mxu0 }
 0x1ab   : > { %v2288_v56 = vsel %vm2224_vm11, %v2192_v41, %v2256_v14  ;;  %v2194_v60 = vadd.f32 %v3599_v59, %v2155_v22  ;;  %v2966_v13 = vadd.f32 %v2910_v36, %v2754_v44  ;;  %v1251_v33 = vpop.f32.mrb[29].mxu1  ;;  %v2111_v34 = vpop.f32.mrb[31].mxu0 }
 0x1ac   : > { %2321 = vst.msk [vmem:[%s3610_s5 + $0xc8] sm:$0xff] %vm2295_vm2, %v2288_v56  ;;  %v2287_v0 = vsel %vm2223_vm12, %v2191_v62, %v2255_v23  ;;  %v2193_v7 = vadd.f32 %v3599_v59, %v2154_v42  ;;  %v2967_v16 = vadd.f32 %v2099_v52, %v1251_v33 }
 0x1ad   : > { %2320 = vst.msk [vmem:[%s3610_s5 + $0xc0] sm:$0xff] %vm2295_vm2, %v2287_v0  ;;  %vm2226_vm13 = vcmp.gt.f32.partialorder %v2194_v60, 0.0  ;;  %v2258_v18 = vmul.f32 0.1, %v2194_v60  ;;  %v2157_v46 = vmul.f32 %v2966_v13, %v3594_v24 }
 0x1ae   : > { %vm2225_vm14 = vcmp.gt.f32.partialorder %v2193_v7, 0.0  ;;  %v2257_v57 = vmul.f32 0.1, %v2193_v7  ;;  %v2156_v27 = vmul.f32 %v2967_v16, %v3594_v24  ;;  %v2757_v11 = vpop.f32.mrb[30].mxu1 }
 0x1af   : > { %v2290_v17 = vsel %vm2226_vm13, %v2194_v60, %v2258_v18  ;;  %v2196_v8 = vadd.f32 %v3599_v59, %v2157_v46  ;;  %v2968_v50 = vadd.f32 %v2913_v45, %v2757_v11  ;;  %v1265_v32 = vpop.f32.mrb[31].mxu1 }
 0x1b0   : > { %2323 = vst.msk [vmem:[%s3610_s5 + $0xd8] sm:$0xff] %vm2295_vm2, %v2290_v17  ;;  %v2289_v15 = vsel %vm2225_vm14, %v2193_v7, %v2257_v57  ;;  %v2195_v58 = vadd.f32 %v3599_v59, %v2156_v27  ;;  %v2969_v51 = vadd.f32 %v2111_v34, %v1265_v32 }
 0x1b1   : > { %2322 = vst.msk [vmem:[%s3610_s5 + $0xd0] sm:$0xff] %vm2295_vm2, %v2289_v15  ;;  %vm2228_vm15 = vcmp.gt.f32.partialorder %v2196_v8, 0.0  ;;  %v2260_v61 = vmul.f32 0.1, %v2196_v8  ;;  %v2159_v2 = vmul.f32 %v2968_v50, %v3594_v24 }
 0x1b2   : > { %vm2227_vm0 = vcmp.gt.f32.partialorder %v2195_v58, 0.0  ;;  %v2259_v31 = vmul.f32 0.1, %v2195_v58  ;;  %v2158_v47 = vmul.f32 %v2969_v51, %v3594_v24 }
 0x1b3   : > { %v2292_v37 = vsel %vm2228_vm15, %v2196_v8, %v2260_v61  ;;  %v2198_v55 = vadd.f32 %v3599_v59, %v2159_v2 }
 0x1b4   : > { %2325 = vst.msk [vmem:[%s3610_s5 + $0xe8] sm:$0xff] %vm2295_vm2, %v2292_v37  ;;  %v2291_v63 = vsel %vm2227_vm0, %v2195_v58, %v2259_v31  ;;  %v2197_v54 = vadd.f32 %v3599_v59, %v2158_v47 }
 0x1b5   : > { %2324 = vst.msk [vmem:[%s3610_s5 + $0xe0] sm:$0xff] %vm2295_vm2, %v2291_v63  ;;  %vm2230_vm1 = vcmp.gt.f32.partialorder %v2198_v55, 0.0  ;;  %v2262_v38 = vmul.f32 0.1, %v2198_v55 }
 0x1b6   : > { %vm2229_vm3 = vcmp.gt.f32.partialorder %v2197_v54, 0.0  ;;  %v2261_v5 = vmul.f32 0.1, %v2197_v54 }
 0x1b7   : > { %v2294_v3 = vsel %vm2230_vm1, %v2198_v55, %v2262_v38 }
 0x1b8   : > { %2327 = vst.msk [vmem:[%s3610_s5 + $0xf8] sm:$0xff] %vm2295_vm2, %v2294_v3  ;;  %v2293_v10 = vsel %vm2229_vm3, %v2197_v54, %v2261_v5 }
 0x1b9   : > { %2326 = vst.msk [vmem:[%s3610_s5 + $0xf0] sm:$0xff] %vm2295_vm2, %v2293_v10 }
 0x1ba PF: > { %s14_s15 = sadd.s32 1, %s3112_s15  }
 0x1bb   : > { %p11_p4 = scmp.ge.s32.totalorder %s14_s15, 4  }
 0x1bd   :  { %13 = sbr.rel (!%p11_p4) target bundleno = 1 (0x1), region = 66 }

</bundles_post_ra>
